<compile_context>
chip_gen: v7x
topology: tpu7x:2x2x1
jax: 0.10.0
libtpu: 0.0.40
codegen_flags: <defaults>
</compile_context>

<pallas_src>
import functools

import jax
import jax.numpy as jnp
from jax import lax
from jax.experimental import pallas as pl
from jax.experimental.pallas import tpu as pltpu


def _cdiv(a, b):
    return (a + b - 1) // b


def _layer_norm_kernel(x_ref, w_ref, b_ref, o_ref, *, eps, one_pass_stats):
    # x_ref: (tile_rows, hidden), w_ref/b_ref: (1, hidden) already in the
    # affine compute dtype (bf16 when the output is bf16, else f32).
    x = x_ref[...].astype(jnp.float32)
    mean = jnp.mean(x, axis=-1, keepdims=True)
    if one_pass_stats:
        # Single live full-tile f32 temp (x); biased variance via E[x^2]-mean^2,
        # clamped against cancellation (fine for LN-scale data).
        var = jnp.maximum(jnp.mean(x * x, axis=-1, keepdims=True) - mean * mean, 0.0)
    else:
        # Two-pass fallback (numerically safest for huge per-row means).
        xc = x - mean
        var = jnp.mean(xc * xc, axis=-1, keepdims=True)
    inv = lax.rsqrt(var + eps)  # EUP rsqrt

    w = w_ref[...]
    b = b_ref[...]
    if o_ref.dtype == jnp.dtype(jnp.bfloat16) and w.dtype == jnp.dtype(jnp.bfloat16):
        # Output affine in bf16 (native VPU on v6e/v7x); reductions stayed f32.
        xn = ((x - mean) * inv).astype(jnp.bfloat16)
        o_ref[...] = xn * w + b
    else:
        o_ref[...] = ((x - mean) * inv * w.astype(jnp.float32)
                      + b.astype(jnp.float32)).astype(o_ref.dtype)


def _pick_tile_rows(rows, hidden, itemsize):
    """Pick a row tile that (a) amortizes per-step overhead and (b) still
    yields a multi-step grid so v7x's 2 TensorCores both get work."""
    # sublane packing: 8 rows for f32, 16 for bf16, 32 for int8/fp8
    packing = 8 * max(1, 4 // itemsize)

    # Per-step input slab target.  f32 needs no upcast temp, so it can go
    # bigger; bf16 keeps ~4 MiB so (one f32 temp + double-buffered in/out)
    # stays comfortably under the 56 MiB limit on v7x's 64 MiB VMEM.
    target_tile_bytes = (8 << 20) if itemsize >= 4 else (4 << 20)
    row_bytes = max(1, hidden * itemsize)
    tr = target_tile_bytes // row_bytes
    tr = max(packing, min(2048, tr))
    tr = (tr // packing) * packing

    # v7x megacore: cap the tile so the row grid has up to ~8 steps when the
    # input allows; dimension_semantics=("parallel",) then splits them across
    # both TensorCores.  No effect on v5e/v6e (single TC) beyond slightly
    # smaller tiles, which are still past the measured roofline plateau.
    row_groups = _cdiv(rows, packing)
    desired_steps = min(8, max(1, row_groups))
    tr_cap = _cdiv(row_groups, desired_steps) * packing
    tr = max(packing, min(tr, tr_cap))
    return tr


def liger_layer_norm(hidden_states, weight, bias, eps=1e-6, *,
                     tile_rows=None, one_pass_stats=True):
    """Forward pass of LigerLayerNorm.

    hidden_states: (..., hidden_size)
    weight, bias:  (hidden_size,)
    """
    orig_shape = hidden_states.shape
    hidden = orig_shape[-1]
    assert weight.shape == (hidden,) and bias.shape == (hidden,)

    x2d = hidden_states.reshape(-1, hidden)
    rows = x2d.shape[0]
    itemsize = jnp.dtype(hidden_states.dtype).itemsize
    out_dtype = hidden_states.dtype

    tr = tile_rows if tile_rows is not None else _pick_tile_rows(rows, hidden, itemsize)
    grid = (pl.cdiv(rows, tr),)  # partial last block is masked by Pallas

    # Pre-cast weight/bias to the affine compute dtype in the wrapper so no
    # per-step cast runs in the kernel body.
    affine_dtype = jnp.bfloat16 if out_dtype == jnp.dtype(jnp.bfloat16) else jnp.float32
    w2d = weight.reshape(1, hidden).astype(affine_dtype)
    b2d = bias.reshape(1, hidden).astype(affine_dtype)

    kernel = functools.partial(_layer_norm_kernel, eps=float(eps),
                               one_pass_stats=one_pass_stats)

    cost = pl.CostEstimate(
        flops=8 * rows * hidden,
        transcendentals=rows,
        bytes_accessed=2 * rows * hidden * itemsize
        + 2 * hidden * jnp.dtype(affine_dtype).itemsize,
    )

    out2d = pl.pallas_call(
        kernel,
        out_shape=jax.ShapeDtypeStruct((rows, hidden), out_dtype),
        grid_spec=pltpu.PrefetchScalarGridSpec(
            num_scalar_prefetch=0,
            grid=grid,
            in_specs=[
                pl.BlockSpec((tr, hidden), lambda i: (i, 0)),
                pl.BlockSpec((1, hidden), lambda i: (0, 0)),  # constant block -> no re-DMA
                pl.BlockSpec((1, hidden), lambda i: (0, 0)),
            ],
            out_specs=pl.BlockSpec((tr, hidden), lambda i: (i, 0)),
        ),
        compiler_params=pltpu.CompilerParams(
            dimension_semantics=("parallel",),   # shards row steps across v7x's 2 TCs
            vmem_limit_bytes=56 << 20,           # > default scoped limits, < v7x 64 MiB
        ),
        cost_estimate=cost,
    )(x2d, w2d, b2d)

    return out2d.reshape(orig_shape)


class LigerLayerNormJax:
    """Mirror of the PyTorch module's parameter setup (deterministic)."""

    def __init__(self, hidden_size, eps=1e-6, bias=False, init_fn="ones"):
        assert init_fn in ["ones", "zeros"]
        self.hidden_size = hidden_size
        self.eps = eps
        self.weight = (
            jnp.ones((hidden_size,), jnp.float32)
            if init_fn == "ones"
            else jnp.zeros((hidden_size,), jnp.float32)
        )
        # bias=False -> zeros; bias=True in torch uses randn, here a
        # deterministic PRNG draw instead.
        if bias:
            self.bias = jax.random.normal(
                jax.random.PRNGKey(42), (hidden_size,), jnp.float32
            )
        else:
            self.bias = jnp.zeros((hidden_size,), jnp.float32)

    def __call__(self, hidden_states):
        return liger_layer_norm(hidden_states, self.weight, self.bias, self.eps)


def _reference(x, w, b, eps):
    xf = x.astype(jnp.float32)
    mean = jnp.mean(xf, axis=-1, keepdims=True)
    var = jnp.mean((xf - mean) ** 2, axis=-1, keepdims=True)
    y = (xf - mean) / jnp.sqrt(var + eps) * w + b
    return y.astype(x.dtype)


if __name__ == "__main__":
    key = jax.random.PRNGKey(0)

    # --- small smoke test matching the module's typical usage -------------
    batch, seq, hidden = 2, 8, 32
    x = jax.random.normal(key, (batch, seq, hidden), jnp.float32)
    ln = LigerLayerNormJax(hidden, eps=1e-6, bias=False, init_fn="ones")
    out = jax.block_until_ready(ln(x))
    ref = _reference(x, ln.weight, ln.bias, 1e-6)
    assert out.shape == x.shape and out.dtype == x.dtype
    assert jnp.max(jnp.abs(out - ref)) < 1e-4

    # --- multi-step grid with a partial last block (cdiv path), bias=True --
    rows2, hidden2 = 1040, 256
    x2 = jax.random.normal(jax.random.PRNGKey(1), (rows2, hidden2), jnp.float32)
    ln2 = LigerLayerNormJax(hidden2, eps=1e-6, bias=True, init_fn="ones")
    out2 = jax.block_until_ready(ln2(x2))
    ref2 = _reference(x2, ln2.weight, ln2.bias, 1e-6)
    assert out2.shape == x2.shape and out2.dtype == x2.dtype
    assert jnp.max(jnp.abs(out2 - ref2)) < 1e-3

    # --- lane-dense bf16 path (bf16 output affine) -------------------------
    rows3, hidden3 = 512, 512
    x3 = jax.random.normal(jax.random.PRNGKey(2), (rows3, hidden3), jnp.float32)
    x3 = x3.astype(jnp.bfloat16)
    ln3 = LigerLayerNormJax(hidden3, eps=1e-6, bias=True, init_fn="ones")
    out3 = jax.block_until_ready(ln3(x3))
    ref3 = _reference(x3, ln3.weight, ln3.bias, 1e-6)
    assert out3.shape == x3.shape and out3.dtype == x3.dtype
    err3 = jnp.max(jnp.abs(out3.astype(jnp.float32) - ref3.astype(jnp.float32)))
    assert err3 < 5e-2

    print("KERNEL_OK")
</pallas_src>

<mosaic_0001>
module attributes {stable_mosaic.version = 11 : i64} {
  func.func @_layer_norm_kernel(%arg0: i32, %arg1: memref<8x32xf32, #tpu.memory_space<vmem>>, %arg2: memref<1x32xf32, #tpu.memory_space<vmem>>, %arg3: memref<1x32xf32, #tpu.memory_space<vmem>>, %arg4: memref<8x32xf32, #tpu.memory_space<vmem>>) attributes {dimension_semantics = [#tpu.dimension_semantics<parallel>], iteration_bounds = array<i64: 2>, scalar_prefetch = 0 : i64, scratch_operands = 0 : i64, tpu.core_type = #tpu.core_type<tc>, window_params = [{transform_indices = @transform_0, window_bounds = array<i64: 8, 32>}, {pipeline_mode = #tpu.pipeline_mode<synchronous>, transform_indices = @transform_1, window_bounds = array<i64: 1, 32>}, {pipeline_mode = #tpu.pipeline_mode<synchronous>, transform_indices = @transform_2, window_bounds = array<i64: 1, 32>}, {transform_indices = @transform_3, window_bounds = array<i64: 8, 32>}]} {
    %c0 = arith.constant 0 : index
    %c0_0 = arith.constant 0 : index
    %0 = vector.load %arg1[%c0, %c0_0] : memref<8x32xf32, #tpu.memory_space<vmem>>, vector<8x32xf32>
    %cst = arith.constant dense<0.000000e+00> : vector<8xf32>
    %1 = vector.multi_reduction <add>, %0, %cst [1] : vector<8x32xf32> to vector<8xf32>
    %2 = vector.shape_cast %1 : vector<8xf32> to vector<8x1xf32>
    %cst_1 = arith.constant 3.200000e+01 : f32
    %3 = vector.broadcast %cst_1 : f32 to vector<8x1xf32>
    %4 = arith.divf %2, %3 : vector<8x1xf32>
    %5 = arith.mulf %0, %0 : vector<8x32xf32>
    %cst_2 = arith.constant dense<0.000000e+00> : vector<8xf32>
    %6 = vector.multi_reduction <add>, %5, %cst_2 [1] : vector<8x32xf32> to vector<8xf32>
    %7 = vector.shape_cast %6 : vector<8xf32> to vector<8x1xf32>
    %cst_3 = arith.constant 3.200000e+01 : f32
    %8 = vector.broadcast %cst_3 : f32 to vector<8x1xf32>
    %9 = arith.divf %7, %8 : vector<8x1xf32>
    %10 = arith.mulf %4, %4 : vector<8x1xf32>
    %11 = arith.subf %9, %10 : vector<8x1xf32>
    %cst_4 = arith.constant 0.000000e+00 : f32
    %12 = vector.broadcast %cst_4 : f32 to vector<8x1xf32>
    %13 = arith.maximumf %11, %12 : vector<8x1xf32>
    %cst_5 = arith.constant 9.99999997E-7 : f32
    %14 = vector.broadcast %cst_5 : f32 to vector<8x1xf32>
    %15 = arith.addf %13, %14 : vector<8x1xf32>
    %16 = math.rsqrt %15 : vector<8x1xf32>
    %c0_6 = arith.constant 0 : index
    %c0_7 = arith.constant 0 : index
    %17 = vector.load %arg2[%c0_6, %c0_7] : memref<1x32xf32, #tpu.memory_space<vmem>>, vector<1x32xf32>
    %c0_8 = arith.constant 0 : index
    %c0_9 = arith.constant 0 : index
    %18 = vector.load %arg3[%c0_8, %c0_9] : memref<1x32xf32, #tpu.memory_space<vmem>>, vector<1x32xf32>
    %19 = vector.broadcast %4 : vector<8x1xf32> to vector<8x32xf32>
    %20 = arith.subf %0, %19 : vector<8x32xf32>
    %21 = vector.broadcast %16 : vector<8x1xf32> to vector<8x32xf32>
    %22 = arith.mulf %20, %21 : vector<8x32xf32>
    %23 = vector.broadcast %17 : vector<1x32xf32> to vector<8x32xf32>
    %24 = arith.mulf %22, %23 : vector<8x32xf32>
    %25 = vector.broadcast %18 : vector<1x32xf32> to vector<8x32xf32>
    %26 = arith.addf %24, %25 : vector<8x32xf32>
    %c0_10 = arith.constant 0 : index
    %c0_11 = arith.constant 0 : index
    %27 = vector.load %arg4[%c0_10, %c0_11] : memref<8x32xf32, #tpu.memory_space<vmem>>, vector<8x32xf32>
    tpu.vector_store %arg4[%c0_10, %c0_11], %26 {strides = array<i32>} : memref<8x32xf32, #tpu.memory_space<vmem>>, vector<8x32xf32>,
    return
  }
  func.func @transform_0(%arg0: i32) -> (i32, i32) {
    %c0_i32 = arith.constant 0 : i32
    %c0_i32_0 = arith.constant 0 : i32
    return %arg0, %c0_i32 : i32, i32
  }
  func.func @transform_1(%arg0: i32) -> (i32, i32) {
    %c0_i32 = arith.constant 0 : i32
    %c0_i32_0 = arith.constant 0 : i32
    %c0_i32_1 = arith.constant 0 : i32
    return %c0_i32, %c0_i32_0 : i32, i32
  }
  func.func @transform_2(%arg0: i32) -> (i32, i32) {
    %c0_i32 = arith.constant 0 : i32
    %c0_i32_0 = arith.constant 0 : i32
    %c0_i32_1 = arith.constant 0 : i32
    return %c0_i32, %c0_i32_0 : i32, i32
  }
  func.func @transform_3(%arg0: i32) -> (i32, i32) {
    %c0_i32 = arith.constant 0 : i32
    %c0_i32_0 = arith.constant 0 : i32
    return %arg0, %c0_i32 : i32, i32
  }
}

</mosaic_0001>

<bundles_post_ra>
// kernel: tpu_custom_call.1
= control target key start
LH: loop header
LB: loop body
LE: loop exit
PB: predicated region body
PF: predicated region fallthrough
CT: control target
= control target key end

     0   :  { %8 = vsyncpa [#allocation3], 0  ;;  %s658_s0 = inlined_call_operand.hbm [shape: f32[16,32], index: 0, kind: input, shape index: {}]   ;;  %s659_s1 = inlined_call_operand.vmem [shape: f32[1,32], index: 1, kind: input, shape index: {}]   ;;  %s660_s2 = inlined_call_operand.vmem [shape: f32[1,32], index: 2, kind: input, shape index: {}]   ;;  %s661_s3 = inlined_call_operand.hbm [shape: f32[16,32], index: 3, kind: output, shape index: {}]  }
   0x1   :  { %10 = vsyncpa [#allocation3 + $0x1], 0 }
   0x2   :  { %11 = vsyncpa [#allocation4], 0 }
   0x3   :  { %13 = vsyncpa [#allocation4 + $0x1], 0  ;;  %s488_s12 = smov 0   ;;  %s490_s13 = smov 0  }
   0x4   :  { %s492_s14 = smov 0   ;;  %s494_s15 = smov 0  }
   0x5 LB: > { %s509_s16 = sadd.s32 4294967295, %s464_s15   ;;  %s306_s17 = sadd.s32 4294967294, %s464_s15   ;;  %s464_s15 = sphi %s494_s15, %s676_s15   ;;  %s460_s14 = sphi %s492_s14, %s675_s14   ;;  %s456_s13 = sphi %s490_s13, %s674_s13   ;;  %s452_s12 = sphi %s488_s12, %s673_s12  }
   0x6   : > { %s513_s18 = sadd.s32 1, %s464_s15   ;;  %s26_s19 = sadd.s32 1, %s460_s14 }
   0x7   : > { %s23_s20 = ssub.s32 %s464_s15, %s513_s18  ;;  %p33_p0 = scmp.ne.s32.totalorder %s460_s14, %s456_s13 }
   0x8   : > { %p24_p1 = scmp.eq.s32.totalorder %s23_s20, 0  ;;  %p34_p2 = scmp.eq.s32.totalorder %s464_s15, 0 }
   0x9   : > { %p39_p3 = scmp.ne.s32.totalorder %s456_s13, %s452_s12  ;;  %p40_p4 = scmp.eq.s32.totalorder %s509_s16, 0 }
   0xa   : > { %s525_s21 = scalar_select %p24_p1, %s460_s14, %s26_s19  }
   0xb   : > { %p527_p5 = por %p34_p2, %p33_p0  ;;  %p531_p6 = por %p40_p4, %p39_p3 }
   0xc   : > { %p105_p7 = scmp.eq.s32.totalorder %s509_s16, 1  ;;  %p111_p8 = scmp.eq.s32.totalorder %s306_s17, 1 }
   0xd   : > { %p332_p10 = scmp.lt.s32.totalorder %s464_s15, 2  ;;  %s137_s26 = sand.u32 1, %s460_s14  }
   0xe   : > { %p538_p11 = por %p105_p7, %p33_p0  ;;  %p542_p12 = por %p111_p8, %p39_p3 }
   0xf   : > { %s310_s27 = sshll.u32 %s464_s15, 7  ;;  %s309_s28 = sshll.u32 %s137_s26, 3 }
  0x10   : > { %s665_s24 = scalar_select %p538_p11, 1, 0 }
  0x11   : > { %s666_s25 = scalar_select %p542_p12, 1, 0 }
  0x12   : > { %s551_s4 = scalar_lea.hbm %s658_s0, %s310_s27  ;;  %s141_s5 = scalar_lea.vmem [#allocation2], %s309_s28 }
  0x13   : > { %s148_s6 = sshll.u32 %s141_s5, 4  ;;  %p555_p13 = pnand %p332_p10, %p527_p5  ;;  %s559_s6 = int_to_ptr.vmem [resolvable:$true] %s148_s6 }
  0x14   : > { %s138_s8 = scalar_lea.sflag [#allocation3], %s137_s26  ;;  %s368_s9 = scalar_lea.hbm %s551_s4, 128 }
  0x15   : > { %p369_p2 = scmp.ne.s32.totalorder %s551_s4, %s368_s9  ;;  %p370_p3 = pneg %p555_p13 }
  0x16   : > { %s373_s17 = scalar_lea.hbm %s658_s0, 256  ;;  %p374_p5 = scmp.lt.u32.totalorder %s551_s4, %s658_s0 }
  0x17   : > { %p371_p4 = pnand %p370_p3, %p369_p2  ;;  %p375_p8 = scmp.lt.u32.totalorder %s373_s17, %s368_s9 }
  0x18   : > { %p377_p9 = scmp.lt.u32.totalorder %s368_s9, %s551_s4 }
  0x19   : > { %p372_p7 = pneg %p371_p4  ;;  %p376_p10 = por %p375_p8, %p374_p5 }
  0x1b   : > { %p378_p0 = por %p377_p9, %p376_p10 }
  0x1d   : > { %p379_p1 = pnand %p378_p0, %p372_p7 }
  0x1f   : > { %382 = shalt.err (!%p379_p1)
}
  0x20   : > { %s383_s22 = scalar_lea.vmem %s559_s6, 128  ;;  %s466_s26 = smov [#allocation2]  }
  0x21   : > { %p384_p2 = scmp.ne.s32.totalorder %s559_s6, %s383_s22  ;;  %s388_s27 = sshll.u32 %s466_s26, 4  ;;  %s389_s27 = int_to_ptr.vmem [resolvable:$false] %s388_s27 }
  0x22   : > { %s390_s28 = scalar_lea.vmem %s389_s27, 256  ;;  %p391_p11 = scmp.lt.s32.totalorder %s559_s6, %s389_s27 }
  0x23   : > { %p386_p4 = pnand %p384_p2, %p370_p3  ;;  %p392_p5 = scmp.lt.s32.totalorder %s390_s28, %s383_s22 }
  0x25   : > { %p387_p12 = pneg %p386_p4  ;;  %p393_p8 = por %p392_p5, %p391_p11 }
  0x27   : > { %p394_p9 = pnand %p393_p8, %p387_p12 }
  0x29   : > { %397 = shalt.err (!%p394_p9)
}
  0x2a   : > { %327 = dma.hbm_to_vmem [thread:$0]  (!%p555_p13), %s551_s4, 128, %s559_s6, %s138_s8  }
  0x2b   : > { %p668_p0 = scmp.lt.s32.totalorder %s464_s15, 3  ;;  %p669_p1 = scmp.ge.s32.totalorder %s464_s15, 1 }
  0x2d   : > { %p154_p3 = pnand %p669_p1, %p668_p0 }
  0x2e   : > { %s593_s29 = sand.u32 (!%p154_p3), 1, %s456_s13  }
  0x2f   : > { %157 = sbr.rel (%p154_p3) target bundleno = 242 (0xf2), region = 32  ;;  %s312_s30 = sshll.u32 (!%p154_p3), %s593_s29, 3 }
  0x30   : > { %s160_s5 = scalar_lea.sflag (!%p154_p3), [#allocation3], %s593_s29  ;;  %s163_s9 = scalar_lea.vmem (!%p154_p3), [#allocation2], %s312_s30 }
  0x36   : > { %443 = dma.done.wait (%p531_p6), %s160_s5, 128  }
  0x37   : > { %445 = vsyncadd (%p531_p6), %s160_s5, 4294967168  ;;  %vm187_vm0 = vcmask 261120   ;;  %v186_v0 = vld [vmem:[%s163_s9] sm:$0xff]  ;;  %s317_s8 = sshll.u32 %s509_s16, 7  ;;  %s185_s10 = scalar_lea.vmem [#allocation5], %s312_s30 }
  0x38   : > { %v188_v1 = vsel %vm187_vm0, %v186_v0, 0.0  ;;  %v193_v2 = vmul.f32 %v186_v0, %v186_v0  ;;  %v314_v14 = vld [vmem:[%s659_s1] ss:$0 sm:$0xff]  ;;  %s236_s11 = sshll.u32 %s185_s10, 4  ;;  %s613_s20 = scalar_lea.hbm %s661_s3, %s317_s8  ;;  %s615_s11 = int_to_ptr.vmem [resolvable:$true] %s236_s11 }
  0x39   : > { %189 = vadd.xlane.f32.xlu0 %v188_v1  ;;  %v315_v16 = vld [vmem:[%s660_s2] ss:$0 sm:$0xff]  ;;  %s223_s22 = scalar_lea.sflag [#allocation4], %s593_s29  ;;  %s398_s26 = scalar_lea.vmem %s615_s11, 128 }
  0x3a   : > { %v194_v3 = vsel %vm187_vm0, %v193_v2, 0.0  ;;  %p399_p6 = scmp.ne.s32.totalorder %s615_s11, %s398_s26  ;;  %p670_p11 = scmp.ne.s32.totalorder %s665_s24, 0 }
  0x3b   : > { %s467_s16 = smov [#allocation5]  }
  0x3c   : > { %p400_p12 = pnand %p399_p6, %p670_p11  ;;  %s402_s27 = sshll.u32 %s467_s16, 4  ;;  %s403_s27 = int_to_ptr.vmem [resolvable:$false] %s402_s27 }
  0x3d   : > { %195 = vadd.xlane.f32.xlu0 %v194_v3  ;;  %s404_s28 = scalar_lea.vmem %s403_s27, 256  ;;  %p405_p7 = scmp.lt.s32.totalorder %s615_s11, %s403_s27 }
  0x3e   : > { %p401_p13 = pneg %p400_p12  ;;  %p406_p10 = scmp.lt.s32.totalorder %s404_s28, %s398_s26 }
  0x40   : > { %p407_p2 = por %p406_p10, %p405_p7 }
  0x42   : > { %p408_p4 = pnand %p407_p2, %p401_p13 }
  0xc6   : > { %v190_v4 = vpop.xlane.xlu0 %189 }
  0xc7   : > { %v192_v5 = vmul.f32 0.03125, %v190_v4 }
  0xc9   : > { %v198_v7 = vmul.f32 %v192_v5, %v192_v5  ;;  %v205_v12 = vsub.f32 %v186_v0, %v192_v5 }
  0xca   : > { %v196_v6 = vpop.xlane.xlu0 %195 }
  0xcb   : > { %v197_v8 = vmul.f32 0.03125, %v196_v6 }
  0xcd   : > { %v199_v9 = vsub.f32 %v197_v8, %v198_v7 }
  0xcf   : > { %v200_v10 = vmax.f32 %v199_v9, 0.0 }
  0xd1   : > { %v201_v11 = vadd.f32 1e-06, %v200_v10 }
  0xd3   : > { %366 = vrsqrt.f32 %v201_v11 }
  0xdd   : > { %v367_v13 = vpop.eup %366 }
  0xde   : > { %v206_v15 = vmul.f32 %v367_v13, %v205_v12 }
  0xe0   : > { %v213_v17 = vmul.f32 %v314_v14, %v206_v15 }
  0xe2   : > { %v220_v18 = vadd.f32 %v315_v16, %v213_v17 }
  0xe4   : > { %221 = vst.msk [vmem:[%s185_s10] sm:$0xff] %vm187_vm0, %v220_v18 }
  0xe5   : > { %411 = shalt.err (!%p408_p4)
}
  0xe6   : > { %s412_s29 = scalar_lea.hbm %s613_s20, 128  ;;  %s416_s9 = scalar_lea.hbm %s661_s3, 256 }
  0xe7   : > { %p413_p5 = scmp.ne.s32.totalorder %s613_s20, %s412_s29  ;;  %p417_p0 = scmp.lt.u32.totalorder %s613_s20, %s661_s3 }
  0xe8   : > { %p418_p1 = scmp.lt.u32.totalorder %s416_s9, %s412_s29  ;;  %p420_p6 = scmp.lt.u32.totalorder %s412_s29, %s613_s20 }
  0xe9   : > { %p414_p8 = pnand %p413_p5, %p670_p11 }
  0xea   : > { %p419_p3 = por %p418_p1, %p417_p0 }
  0xeb   : > { %p415_p9 = pneg %p414_p8 }
  0xec   : > { %p421_p12 = por %p420_p6, %p419_p3 }
  0xee   : > { %p422_p13 = pnand %p421_p12, %p415_p9 }
  0xf0   : > { %425 = shalt.err (!%p422_p13)
}
  0xf1   : > { %322 = dma.vmem_to_hbm [thread:$0]  (%p670_p11), %s615_s11, 128, %s613_s20, %s223_s22  }
  0xf2 PF: > { %s248_s6 = sand.u32 1, %s452_s12   ;;  %p671_p7 = scmp.ne.s32.totalorder %s666_s25, 0 }
  0xf3   : > { %p672_p10 = scmp.ge.s32.totalorder %s464_s15, 2  ;;  %s249_s7 = scalar_lea.sflag [#allocation4], %s248_s6 }
  0xf5   : > { %p329_p2 = pnand %p672_p10, %p671_p7 }
  0xf7   : > { %447 = dma.done.wait (!%p329_p2), %s249_s7, 128  }
  0xf8   : > { %449 = vsyncadd (!%p329_p2), %s249_s7, 4294967168  ;;  %p16_p4 = scmp.ge.s32.totalorder %s513_s18, 4   ;;  %s673_s12 = smov %s456_s13 }
  0xf9   : > { %s674_s13 = smov %s460_s14  ;;  %s675_s14 = smov %s525_s21 }
  0xfa   : > { %s676_s15 = smov %s513_s18  ;;  %18 = sbr.rel (!%p16_p4) target bundleno = 5 (0x5), region = 77 }
 0x101   :  { %254 = vsyncpa [#allocation3], 1 }
 0x102   :  { %256 = vsyncpa [#allocation3 + $0x1], 1 }
 0x103   :  { %257 = vsyncpa [#allocation4], 1 }
 0x104   :  { %259 = vsyncpa [#allocation4 + $0x1], 1 }

</bundles_post_ra>
